<compile_context>
chip_gen: v7x
topology: tpu7x:2x2x1
jax: 0.10.0
libtpu: 0.0.40
codegen_flags: <defaults>
</compile_context>

<pallas_src>
import functools
import math

import jax
import jax.numpy as jnp
from jax.experimental import pallas as pl
from jax.experimental.pallas import tpu as pltpu

LN_EPS = 1e-12


def _round_up(x, m):
    return ((x + m - 1) // m) * m


def _gelu_exact(x):
    # torch/BERT exact gelu: 0.5 * x * (1 + erf(x / sqrt(2)))
    return 0.5 * x * (1.0 + jax.lax.erf(x * (1.0 / math.sqrt(2.0))))


def _layernorm_f32(x, gamma, beta):
    x = x.astype(jnp.float32)
    mu = jnp.mean(x, axis=-1, keepdims=True)
    var = jnp.mean((x - mu) ** 2, axis=-1, keepdims=True)
    xhat = (x - mu) / jnp.sqrt(var + LN_EPS)
    return gamma.astype(jnp.float32) * xhat + beta.astype(jnp.float32)


# ----------------------------------------------------------------------------
# Fused kernel: BertLMPredictionHead + BertEntPredictionHead.
# Grid = (num_token_blocks, num_vocab_blocks); vocab is the trailing
# "arbitrary" axis (scratch + entity output carry across it).
# ----------------------------------------------------------------------------
def fused_heads_kernel(
    x_ref,      # (TM, H)       token block
    wd_ref,     # (H, H)        dense weight, pre-transposed (x @ wd)
    bd_ref,     # (1, H)
    g_ref,      # (1, H)        LayerNorm gamma
    b_ref,      # (1, H)        LayerNorm beta
    emb_ref,    # (H, TN)       decoder (embedding) weight, pre-transposed tile
    bvoc_ref,   # (1, TN)       decoder bias tile
    we_ref,     # (H, E)        entity dense weight, pre-transposed
    be_ref,     # (1, E)
    eg_ref,     # (1, E)        entity LayerNorm gamma
    eb_ref,     # (1, E)        entity LayerNorm beta
    cand_ref,   # (E, NCpad)    candidate embeddings, pre-transposed + padded
    mlm_out_ref,  # (TM, TN)
    ent_out_ref,  # (TM, NCpad)  resident across the vocab axis
    h_scratch,    # (TM, H)  decoder-dtype transformed hidden, persists over j
):
    j = pl.program_id(1)

    # ---- transform + entity head: only once per token block (j == 0) -------
    @pl.when(j == 0)
    def _():
        x = x_ref[...]
        # MLM transform: dense -> gelu -> LayerNorm  (f32 math on (TM, H))
        h = jnp.dot(x, wd_ref[...], preferred_element_type=jnp.float32)
        h = _gelu_exact(h + bd_ref[...].astype(jnp.float32))
        h = _layernorm_f32(h, g_ref[...], b_ref[...])
        # Cache in the decoder-weight dtype so the vocab loop needs no cast.
        h_scratch[...] = h.astype(h_scratch.dtype)

        # Entity transform: dense(H->E) -> gelu -> LayerNorm -> @ candidates
        he = jnp.dot(x, we_ref[...], preferred_element_type=jnp.float32)
        he = _gelu_exact(he + be_ref[...].astype(jnp.float32))
        he = _layernorm_f32(he, eg_ref[...], eb_ref[...])
        ent = jnp.dot(he.astype(cand_ref.dtype), cand_ref[...],
                      preferred_element_type=jnp.float32)
        ent_out_ref[...] = ent.astype(ent_out_ref.dtype)

    # ---- MLM logits for this (token block, vocab block) tile ---------------
    logits = jnp.dot(h_scratch[...], emb_ref[...],
                     preferred_element_type=jnp.float32)
    mlm_out_ref[...] = (logits + bvoc_ref[...].astype(jnp.float32)
                        ).astype(mlm_out_ref.dtype)


# ----------------------------------------------------------------------------
# Wrapper.
# ----------------------------------------------------------------------------
def ernie_pretraining_heads(sequence_output, pooled_output, candidate, params,
                            *, tm_max=256, tn_max=512):
    """Pallas implementation of ErniePreTrainingHeads.forward."""
    B, S, H = sequence_output.shape
    T = B * S
    x2d = sequence_output.reshape(T, H)
    out_dtype = sequence_output.dtype

    cand = jnp.squeeze(candidate, axis=0)            # [NC, E]
    NC, E = cand.shape
    V = params["emb"].shape[0]

    # ---- tile sizes / padding (lane-dense, (8,128)-aligned) ----------------
    TM = min(tm_max, _round_up(T, 8))
    T_pad = _round_up(T, TM)
    TN = min(tn_max, _round_up(V, 128))
    V_pad = _round_up(V, TN)
    NC_pad = _round_up(NC, 128)

    # ---- one-time weight prep: pre-transpose + pad (no in-kernel .T) -------
    wd_t = params["dense_w"].T                        # [H, H]
    emb_t = params["emb"].T                           # [H, V]
    we_t = params["ent_dense_w"].T                    # [H, E]
    cand_t = cand.T                                   # [E, NC]
    bvoc = params["vocab_b"]

    if V_pad != V:
        emb_t = jnp.pad(emb_t, ((0, 0), (0, V_pad - V)))
        bvoc = jnp.pad(bvoc, (0, V_pad - V))
    if NC_pad != NC:
        cand_t = jnp.pad(cand_t, ((0, 0), (0, NC_pad - NC)))
    if T_pad != T:
        x2d = jnp.pad(x2d, ((0, T_pad - T), (0, 0)))

    bd = params["dense_b"][None, :]
    ln_g = params["ln_g"][None, :]
    ln_b = params["ln_b"][None, :]
    be = params["ent_dense_b"][None, :]
    eg = params["ent_ln_g"][None, :]
    eb = params["ent_ln_b"][None, :]
    bvoc2 = bvoc[None, :]

    grid = (T_pad // TM, V_pad // TN)

    # Advisory cost estimate for the XLA scheduler.
    itemsize = jnp.dtype(out_dtype).itemsize
    n_i = grid[0]
    flops = (2 * T_pad * H * H            # MLM transform
             + 2 * T_pad * H * E          # entity transform
             + 2 * T_pad * H * V_pad      # vocab logits
             + 2 * T_pad * E * NC_pad)    # entity logits
    transcendentals = T_pad * (H + E)
    bytes_accessed = (T_pad * H * itemsize
                      + n_i * H * V_pad * itemsize
                      + T_pad * V_pad * itemsize
                      + T_pad * NC_pad * itemsize)

    dec_dtype = params["emb"].dtype

    mlm_pad, ent_pad = pl.pallas_call(
        fused_heads_kernel,
        out_shape=(
            jax.ShapeDtypeStruct((T_pad, V_pad), out_dtype),
            jax.ShapeDtypeStruct((T_pad, NC_pad), out_dtype),
        ),
        grid=grid,
        in_specs=[
            pl.BlockSpec((TM, H), lambda i, j: (i, 0)),       # x
            pl.BlockSpec((H, H), lambda i, j: (0, 0)),        # dense W^T
            pl.BlockSpec((1, H), lambda i, j: (0, 0)),        # dense b
            pl.BlockSpec((1, H), lambda i, j: (0, 0)),        # LN gamma
            pl.BlockSpec((1, H), lambda i, j: (0, 0)),        # LN beta
            pl.BlockSpec((H, TN), lambda i, j: (0, j)),       # emb^T tile
            pl.BlockSpec((1, TN), lambda i, j: (0, j)),       # vocab bias tile
            pl.BlockSpec((H, E), lambda i, j: (0, 0)),        # ent W^T
            pl.BlockSpec((1, E), lambda i, j: (0, 0)),        # ent b
            pl.BlockSpec((1, E), lambda i, j: (0, 0)),        # ent LN gamma
            pl.BlockSpec((1, E), lambda i, j: (0, 0)),        # ent LN beta
            pl.BlockSpec((E, NC_pad), lambda i, j: (0, 0)),   # candidates^T
        ],
        out_specs=(
            pl.BlockSpec((TM, TN), lambda i, j: (i, j)),      # MLM logits
            pl.BlockSpec((TM, NC_pad), lambda i, j: (i, 0)),  # entity logits
        ),
        scratch_shapes=[pltpu.VMEM((TM, H), dec_dtype)],
        compiler_params=pltpu.CompilerParams(
            dimension_semantics=("parallel", "arbitrary"),
            vmem_limit_bytes=64 * 1024 * 1024,
        ),
        cost_estimate=pl.CostEstimate(
            flops=flops,
            transcendentals=transcendentals,
            bytes_accessed=bytes_accessed,
        ),
    )(x2d, wd_t, bd, ln_g, ln_b, emb_t, bvoc2, we_t, be, eg, eb, cand_t)

    prediction_scores = mlm_pad[:T, :V].reshape(B, S, V)
    prediction_scores_ent = ent_pad[:T, :NC].reshape(B, S, NC)

    # seq_relationship: 2-wide output -> plain jnp (a Pallas kernel here would
    # be all masked-store / launch overhead).
    seq_relationship = (pooled_output @ params["seq_w"].T) + params["seq_b"]

    return prediction_scores, seq_relationship, prediction_scores_ent


# ----------------------------------------------------------------------------
# Pure-JAX reference (mirrors the PyTorch module) for a correctness check.
# ----------------------------------------------------------------------------
def reference(sequence_output, pooled_output, candidate, params):
    def transform(x, w, b, g, beta):
        h = x @ w.T + b
        h = _gelu_exact(h)
        mu = jnp.mean(h, axis=-1, keepdims=True)
        var = jnp.mean((h - mu) ** 2, axis=-1, keepdims=True)
        return g * ((h - mu) / jnp.sqrt(var + LN_EPS)) + beta

    h = transform(sequence_output, params["dense_w"], params["dense_b"],
                  params["ln_g"], params["ln_b"])
    prediction_scores = h @ params["emb"].T + params["vocab_b"]

    seq_rel = pooled_output @ params["seq_w"].T + params["seq_b"]

    he = transform(sequence_output, params["ent_dense_w"],
                   params["ent_dense_b"], params["ent_ln_g"],
                   params["ent_ln_b"])
    cand = jnp.squeeze(candidate, axis=0)
    prediction_scores_ent = he @ cand.T
    return prediction_scores, seq_rel, prediction_scores_ent


if __name__ == "__main__":
    # Small synthetic config: hidden=32, vocab=64, entity_size=32,
    # batch=2, seq=8, num_candidates=16.
    B, S, H, V, E, NC = 2, 8, 32, 64, 32, 16

    key = jax.random.PRNGKey(0)
    ks = jax.random.split(key, 12)

    params = {
        # BertPredictionHeadTransform
        "dense_w": 0.05 * jax.random.normal(ks[0], (H, H), jnp.float32),
        "dense_b": 0.01 * jax.random.normal(ks[1], (H,), jnp.float32),
        "ln_g": jnp.ones((H,), jnp.float32),
        "ln_b": jnp.zeros((H,), jnp.float32),
        # decoder weights = bert embedding weights [vocab, hidden], bias zeros
        "emb": 0.05 * jax.random.normal(ks[2], (V, H), jnp.float32),
        "vocab_b": jnp.zeros((V,), jnp.float32),
        # BertEntPredictionHead transform (hidden -> entity_size)
        "ent_dense_w": 0.05 * jax.random.normal(ks[3], (E, H), jnp.float32),
        "ent_dense_b": 0.01 * jax.random.normal(ks[4], (E,), jnp.float32),
        "ent_ln_g": jnp.ones((E,), jnp.float32),
        "ent_ln_b": jnp.zeros((E,), jnp.float32),
        # seq_relationship Linear(hidden, 2)
        "seq_w": 0.05 * jax.random.normal(ks[5], (2, H), jnp.float32),
        "seq_b": 0.01 * jax.random.normal(ks[6], (2,), jnp.float32),
    }

    sequence_output = jax.random.normal(ks[7], (B, S, H), jnp.float32)
    pooled_output = jax.random.normal(ks[8], (B, H), jnp.float32)
    candidate = jax.random.normal(ks[9], (1, NC, E), jnp.float32)

    fn = jax.jit(functools.partial(ernie_pretraining_heads, params=params))
    outs = fn(sequence_output, pooled_output, candidate)
    outs = jax.block_until_ready(outs)

    refs = reference(sequence_output, pooled_output, candidate, params)
    for o, r in zip(outs, refs):
        assert o.shape == r.shape and o.dtype == r.dtype, (o.shape, r.shape)
        assert jnp.allclose(o, r, rtol=1e-4, atol=1e-4), float(
            jnp.max(jnp.abs(o - r)))

    print("KERNEL_OK")
</pallas_src>

<mosaic_0001>
module attributes {stable_mosaic.version = 11 : i64} {
  func.func @fused_heads_kernel(%arg0: i32, %arg1: i32, %arg2: memref<16x32xf32, #tpu.memory_space<vmem>>, %arg3: memref<32x32xf32, #tpu.memory_space<vmem>>, %arg4: memref<1x32xf32, #tpu.memory_space<vmem>>, %arg5: memref<1x32xf32, #tpu.memory_space<vmem>>, %arg6: memref<1x32xf32, #tpu.memory_space<vmem>>, %arg7: memref<32x128xf32, #tpu.memory_space<vmem>>, %arg8: memref<1x128xf32, #tpu.memory_space<vmem>>, %arg9: memref<32x32xf32, #tpu.memory_space<vmem>>, %arg10: memref<1x32xf32, #tpu.memory_space<vmem>>, %arg11: memref<1x32xf32, #tpu.memory_space<vmem>>, %arg12: memref<1x32xf32, #tpu.memory_space<vmem>>, %arg13: memref<32x128xf32, #tpu.memory_space<vmem>>, %arg14: memref<16x128xf32, #tpu.memory_space<vmem>>, %arg15: memref<16x128xf32, #tpu.memory_space<vmem>>, %arg16: memref<16x32xf32, #tpu.memory_space<vmem>>) attributes {dimension_semantics = [#tpu.dimension_semantics<parallel>, #tpu.dimension_semantics<arbitrary>], iteration_bounds = array<i64: 1, 1>, scalar_prefetch = 0 : i64, scratch_operands = 1 : i64, tpu.core_type = #tpu.core_type<tc>, window_params = [{transform_indices = @transform_0, window_bounds = array<i64: 16, 32>}, {pipeline_mode = #tpu.pipeline_mode<synchronous>, transform_indices = @transform_1, window_bounds = array<i64: 32, 32>}, {pipeline_mode = #tpu.pipeline_mode<synchronous>, transform_indices = @transform_2, window_bounds = array<i64: 1, 32>}, {pipeline_mode = #tpu.pipeline_mode<synchronous>, transform_indices = @transform_3, window_bounds = array<i64: 1, 32>}, {pipeline_mode = #tpu.pipeline_mode<synchronous>, transform_indices = @transform_4, window_bounds = array<i64: 1, 32>}, {transform_indices = @transform_5, window_bounds = array<i64: 32, 128>}, {transform_indices = @transform_6, window_bounds = array<i64: 1, 128>}, {pipeline_mode = #tpu.pipeline_mode<synchronous>, transform_indices = @transform_7, window_bounds = array<i64: 32, 32>}, {pipeline_mode = #tpu.pipeline_mode<synchronous>, transform_indices = @transform_8, window_bounds = array<i64: 1, 32>}, {pipeline_mode = #tpu.pipeline_mode<synchronous>, transform_indices = @transform_9, window_bounds = array<i64: 1, 32>}, {pipeline_mode = #tpu.pipeline_mode<synchronous>, transform_indices = @transform_10, window_bounds = array<i64: 1, 32>}, {pipeline_mode = #tpu.pipeline_mode<synchronous>, transform_indices = @transform_11, window_bounds = array<i64: 32, 128>}, {transform_indices = @transform_12, window_bounds = array<i64: 16, 128>}, {transform_indices = @transform_13, window_bounds = array<i64: 16, 128>}]} {
    %c0_i32 = arith.constant 0 : i32
    %0 = arith.cmpi eq, %arg1, %c0_i32 : i32
    %1 = arith.extui %0 : i1 to i32
    %c0_i32_0 = arith.constant 0 : i32
    %2 = arith.cmpi ne, %1, %c0_i32_0 : i32
    scf.if %2 {
      %c0_8 = arith.constant 0 : index
      %c0_9 = arith.constant 0 : index
      %10 = vector.load %arg2[%c0_8, %c0_9] : memref<16x32xf32, #tpu.memory_space<vmem>>, vector<16x32xf32>
      %c0_10 = arith.constant 0 : index
      %c0_11 = arith.constant 0 : index
      %11 = vector.load %arg3[%c0_10, %c0_11] : memref<32x32xf32, #tpu.memory_space<vmem>>, vector<32x32xf32>
      %cst_12 = arith.constant dense<0.000000e+00> : vector<16x32xf32>
      %12 = tpu.matmul %10, %11, %cst_12 {dimension_numbers = #tpu.dot_dimension_numbers<[1], [0], [0], [1], [0, 0, 1, 1], [], []>} : vector<16x32xf32>, vector<32x32xf32>, vector<16x32xf32> -> vector<16x32xf32>
      %c0_13 = arith.constant 0 : index
      %c0_14 = arith.constant 0 : index
      %13 = vector.load %arg4[%c0_13, %c0_14] : memref<1x32xf32, #tpu.memory_space<vmem>>, vector<1x32xf32>
      %14 = vector.broadcast %13 : vector<1x32xf32> to vector<16x32xf32>
      %15 = arith.addf %12, %14 : vector<16x32xf32>
      %cst_15 = arith.constant 5.000000e-01 : f32
      %16 = vector.broadcast %cst_15 : f32 to vector<16x32xf32>
      %17 = arith.mulf %16, %15 : vector<16x32xf32>
      %cst_16 = arith.constant 0.707106769 : f32
      %18 = vector.broadcast %cst_16 : f32 to vector<16x32xf32>
      %19 = arith.mulf %15, %18 : vector<16x32xf32>
      %20 = math.erf %19 : vector<16x32xf32>
      %cst_17 = arith.constant 1.000000e+00 : f32
      %21 = vector.broadcast %cst_17 : f32 to vector<16x32xf32>
      %22 = arith.addf %21, %20 : vector<16x32xf32>
      %23 = arith.mulf %17, %22 : vector<16x32xf32>
      %c0_18 = arith.constant 0 : index
      %c0_19 = arith.constant 0 : index
      %24 = vector.load %arg5[%c0_18, %c0_19] : memref<1x32xf32, #tpu.memory_space<vmem>>, vector<1x32xf32>
      %c0_20 = arith.constant 0 : index
      %c0_21 = arith.constant 0 : index
      %25 = vector.load %arg6[%c0_20, %c0_21] : memref<1x32xf32, #tpu.memory_space<vmem>>, vector<1x32xf32>
      %cst_22 = arith.constant dense<0.000000e+00> : vector<16xf32>
      %26 = vector.multi_reduction <add>, %23, %cst_22 [1] : vector<16x32xf32> to vector<16xf32>
      %27 = vector.shape_cast %26 : vector<16xf32> to vector<16x1xf32>
      %cst_23 = arith.constant 3.200000e+01 : f32
      %28 = vector.broadcast %cst_23 : f32 to vector<16x1xf32>
      %29 = arith.divf %27, %28 : vector<16x1xf32>
      %30 = vector.broadcast %29 : vector<16x1xf32> to vector<16x32xf32>
      %31 = arith.subf %23, %30 : vector<16x32xf32>
      %32 = arith.mulf %31, %31 : vector<16x32xf32>
      %cst_24 = arith.constant dense<0.000000e+00> : vector<16xf32>
      %33 = vector.multi_reduction <add>, %32, %cst_24 [1] : vector<16x32xf32> to vector<16xf32>
      %34 = vector.shape_cast %33 : vector<16xf32> to vector<16x1xf32>
      %cst_25 = arith.constant 3.200000e+01 : f32
      %35 = vector.broadcast %cst_25 : f32 to vector<16x1xf32>
      %36 = arith.divf %34, %35 : vector<16x1xf32>
      %37 = vector.broadcast %29 : vector<16x1xf32> to vector<16x32xf32>
      %38 = arith.subf %23, %37 : vector<16x32xf32>
      %cst_26 = arith.constant 9.99999996E-13 : f32
      %39 = vector.broadcast %cst_26 : f32 to vector<16x1xf32>
      %40 = arith.addf %36, %39 : vector<16x1xf32>
      %41 = math.sqrt %40 : vector<16x1xf32>
      %42 = vector.broadcast %41 : vector<16x1xf32> to vector<16x32xf32>
      %43 = arith.divf %38, %42 : vector<16x32xf32>
      %44 = vector.broadcast %24 : vector<1x32xf32> to vector<16x32xf32>
      %45 = arith.mulf %44, %43 : vector<16x32xf32>
      %46 = vector.broadcast %25 : vector<1x32xf32> to vector<16x32xf32>
      %47 = arith.addf %45, %46 : vector<16x32xf32>
      %c0_27 = arith.constant 0 : index
      %c0_28 = arith.constant 0 : index
      %48 = vector.load %arg16[%c0_27, %c0_28] : memref<16x32xf32, #tpu.memory_space<vmem>>, vector<16x32xf32>
      tpu.vector_store %arg16[%c0_27, %c0_28], %47 {strides = array<i32>} : memref<16x32xf32, #tpu.memory_space<vmem>>, vector<16x32xf32>,
      %c0_29 = arith.constant 0 : index
      %c0_30 = arith.constant 0 : index
      %49 = vector.load %arg9[%c0_29, %c0_30] : memref<32x32xf32, #tpu.memory_space<vmem>>, vector<32x32xf32>
      %cst_31 = arith.constant dense<0.000000e+00> : vector<16x32xf32>
      %50 = tpu.matmul %10, %49, %cst_31 {dimension_numbers = #tpu.dot_dimension_numbers<[1], [0], [0], [1], [0, 0, 1, 1], [], []>} : vector<16x32xf32>, vector<32x32xf32>, vector<16x32xf32> -> vector<16x32xf32>
      %c0_32 = arith.constant 0 : index
      %c0_33 = arith.constant 0 : index
      %51 = vector.load %arg10[%c0_32, %c0_33] : memref<1x32xf32, #tpu.memory_space<vmem>>, vector<1x32xf32>
      %52 = vector.broadcast %51 : vector<1x32xf32> to vector<16x32xf32>
      %53 = arith.addf %50, %52 : vector<16x32xf32>
      %cst_34 = arith.constant 5.000000e-01 : f32
      %54 = vector.broadcast %cst_34 : f32 to vector<16x32xf32>
      %55 = arith.mulf %54, %53 : vector<16x32xf32>
      %cst_35 = arith.constant 0.707106769 : f32
      %56 = vector.broadcast %cst_35 : f32 to vector<16x32xf32>
      %57 = arith.mulf %53, %56 : vector<16x32xf32>
      %58 = math.erf %57 : vector<16x32xf32>
      %cst_36 = arith.constant 1.000000e+00 : f32
      %59 = vector.broadcast %cst_36 : f32 to vector<16x32xf32>
      %60 = arith.addf %59, %58 : vector<16x32xf32>
      %61 = arith.mulf %55, %60 : vector<16x32xf32>
      %c0_37 = arith.constant 0 : index
      %c0_38 = arith.constant 0 : index
      %62 = vector.load %arg11[%c0_37, %c0_38] : memref<1x32xf32, #tpu.memory_space<vmem>>, vector<1x32xf32>
      %c0_39 = arith.constant 0 : index
      %c0_40 = arith.constant 0 : index
      %63 = vector.load %arg12[%c0_39, %c0_40] : memref<1x32xf32, #tpu.memory_space<vmem>>, vector<1x32xf32>
      %cst_41 = arith.constant dense<0.000000e+00> : vector<16xf32>
      %64 = vector.multi_reduction <add>, %61, %cst_41 [1] : vector<16x32xf32> to vector<16xf32>
      %65 = vector.shape_cast %64 : vector<16xf32> to vector<16x1xf32>
      %cst_42 = arith.constant 3.200000e+01 : f32
      %66 = vector.broadcast %cst_42 : f32 to vector<16x1xf32>
      %67 = arith.divf %65, %66 : vector<16x1xf32>
      %68 = vector.broadcast %67 : vector<16x1xf32> to vector<16x32xf32>
      %69 = arith.subf %61, %68 : vector<16x32xf32>
      %70 = arith.mulf %69, %69 : vector<16x32xf32>
      %cst_43 = arith.constant dense<0.000000e+00> : vector<16xf32>
      %71 = vector.multi_reduction <add>, %70, %cst_43 [1] : vector<16x32xf32> to vector<16xf32>
      %72 = vector.shape_cast %71 : vector<16xf32> to vector<16x1xf32>
      %cst_44 = arith.constant 3.200000e+01 : f32
      %73 = vector.broadcast %cst_44 : f32 to vector<16x1xf32>
      %74 = arith.divf %72, %73 : vector<16x1xf32>
      %75 = vector.broadcast %67 : vector<16x1xf32> to vector<16x32xf32>
      %76 = arith.subf %61, %75 : vector<16x32xf32>
      %cst_45 = arith.constant 9.99999996E-13 : f32
      %77 = vector.broadcast %cst_45 : f32 to vector<16x1xf32>
      %78 = arith.addf %74, %77 : vector<16x1xf32>
      %79 = math.sqrt %78 : vector<16x1xf32>
      %80 = vector.broadcast %79 : vector<16x1xf32> to vector<16x32xf32>
      %81 = arith.divf %76, %80 : vector<16x32xf32>
      %82 = vector.broadcast %62 : vector<1x32xf32> to vector<16x32xf32>
      %83 = arith.mulf %82, %81 : vector<16x32xf32>
      %84 = vector.broadcast %63 : vector<1x32xf32> to vector<16x32xf32>
      %85 = arith.addf %83, %84 : vector<16x32xf32>
      %c0_46 = arith.constant 0 : index
      %c0_47 = arith.constant 0 : index
      %86 = vector.load %arg13[%c0_46, %c0_47] : memref<32x128xf32, #tpu.memory_space<vmem>>, vector<32x128xf32>
      %cst_48 = arith.constant dense<0.000000e+00> : vector<16x128xf32>
      %87 = tpu.matmul %85, %86, %cst_48 {dimension_numbers = #tpu.dot_dimension_numbers<[1], [0], [0], [1], [0, 0, 1, 1], [], []>} : vector<16x32xf32>, vector<32x128xf32>, vector<16x128xf32> -> vector<16x128xf32>
      %c0_49 = arith.constant 0 : index
      %c0_50 = arith.constant 0 : index
      %88 = vector.load %arg15[%c0_49, %c0_50] : memref<16x128xf32, #tpu.memory_space<vmem>>, vector<16x128xf32>
      tpu.vector_store %arg15[%c0_49, %c0_50], %87 {strides = array<i32>} : memref<16x128xf32, #tpu.memory_space<vmem>>, vector<16x128xf32>,
    } else {
    }
    %c0 = arith.constant 0 : index
    %c0_1 = arith.constant 0 : index
    %3 = vector.load %arg16[%c0, %c0_1] : memref<16x32xf32, #tpu.memory_space<vmem>>, vector<16x32xf32>
    %c0_2 = arith.constant 0 : index
    %c0_3 = arith.constant 0 : index
    %4 = vector.load %arg7[%c0_2, %c0_3] : memref<32x128xf32, #tpu.memory_space<vmem>>, vector<32x128xf32>
    %cst = arith.constant dense<0.000000e+00> : vector<16x128xf32>
    %5 = tpu.matmul %3, %4, %cst {dimension_numbers = #tpu.dot_dimension_numbers<[1], [0], [0], [1], [0, 0, 1, 1], [], []>} : vector<16x32xf32>, vector<32x128xf32>, vector<16x128xf32> -> vector<16x128xf32>
    %c0_4 = arith.constant 0 : index
    %c0_5 = arith.constant 0 : index
    %6 = vector.load %arg8[%c0_4, %c0_5] : memref<1x128xf32, #tpu.memory_space<vmem>>, vector<1x128xf32>
    %7 = vector.broadcast %6 : vector<1x128xf32> to vector<16x128xf32>
    %8 = arith.addf %5, %7 : vector<16x128xf32>
    %c0_6 = arith.constant 0 : index
    %c0_7 = arith.constant 0 : index
    %9 = vector.load %arg14[%c0_6, %c0_7] : memref<16x128xf32, #tpu.memory_space<vmem>>, vector<16x128xf32>
    tpu.vector_store %arg14[%c0_6, %c0_7], %8 {strides = array<i32>} : memref<16x128xf32, #tpu.memory_space<vmem>>, vector<16x128xf32>,
    return
  }
  func.func @transform_0(%arg0: i32, %arg1: i32) -> (i32, i32) {
    %c0_i32 = arith.constant 0 : i32
    %c0_i32_0 = arith.constant 0 : i32
    return %arg0, %c0_i32 : i32, i32
  }
  func.func @transform_1(%arg0: i32, %arg1: i32) -> (i32, i32) {
    %c0_i32 = arith.constant 0 : i32
    %c0_i32_0 = arith.constant 0 : i32
    %c0_i32_1 = arith.constant 0 : i32
    return %c0_i32, %c0_i32_0 : i32, i32
  }
  func.func @transform_2(%arg0: i32, %arg1: i32) -> (i32, i32) {
    %c0_i32 = arith.constant 0 : i32
    %c0_i32_0 = arith.constant 0 : i32
    %c0_i32_1 = arith.constant 0 : i32
    return %c0_i32, %c0_i32_0 : i32, i32
  }
  func.func @transform_3(%arg0: i32, %arg1: i32) -> (i32, i32) {
    %c0_i32 = arith.constant 0 : i32
    %c0_i32_0 = arith.constant 0 : i32
    %c0_i32_1 = arith.constant 0 : i32
    return %c0_i32, %c0_i32_0 : i32, i32
  }
  func.func @transform_4(%arg0: i32, %arg1: i32) -> (i32, i32) {
    %c0_i32 = arith.constant 0 : i32
    %c0_i32_0 = arith.constant 0 : i32
    %c0_i32_1 = arith.constant 0 : i32
    return %c0_i32, %c0_i32_0 : i32, i32
  }
  func.func @transform_5(%arg0: i32, %arg1: i32) -> (i32, i32) {
    %c0_i32 = arith.constant 0 : i32
    %c0_i32_0 = arith.constant 0 : i32
    return %c0_i32, %arg1 : i32, i32
  }
  func.func @transform_6(%arg0: i32, %arg1: i32) -> (i32, i32) {
    %c0_i32 = arith.constant 0 : i32
    %c0_i32_0 = arith.constant 0 : i32
    return %c0_i32, %arg1 : i32, i32
  }
  func.func @transform_7(%arg0: i32, %arg1: i32) -> (i32, i32) {
    %c0_i32 = arith.constant 0 : i32
    %c0_i32_0 = arith.constant 0 : i32
    %c0_i32_1 = arith.constant 0 : i32
    return %c0_i32, %c0_i32_0 : i32, i32
  }
  func.func @transform_8(%arg0: i32, %arg1: i32) -> (i32, i32) {
    %c0_i32 = arith.constant 0 : i32
    %c0_i32_0 = arith.constant 0 : i32
    %c0_i32_1 = arith.constant 0 : i32
    return %c0_i32, %c0_i32_0 : i32, i32
  }
  func.func @transform_9(%arg0: i32, %arg1: i32) -> (i32, i32) {
    %c0_i32 = arith.constant 0 : i32
    %c0_i32_0 = arith.constant 0 : i32
    %c0_i32_1 = arith.constant 0 : i32
    return %c0_i32, %c0_i32_0 : i32, i32
  }
  func.func @transform_10(%arg0: i32, %arg1: i32) -> (i32, i32) {
    %c0_i32 = arith.constant 0 : i32
    %c0_i32_0 = arith.constant 0 : i32
    %c0_i32_1 = arith.constant 0 : i32
    return %c0_i32, %c0_i32_0 : i32, i32
  }
  func.func @transform_11(%arg0: i32, %arg1: i32) -> (i32, i32) {
    %c0_i32 = arith.constant 0 : i32
    %c0_i32_0 = arith.constant 0 : i32
    %c0_i32_1 = arith.constant 0 : i32
    return %c0_i32, %c0_i32_0 : i32, i32
  }
  func.func @transform_12(%arg0: i32, %arg1: i32) -> (i32, i32) {
    %c0_i32 = arith.constant 0 : i32
    return %arg0, %arg1 : i32, i32
  }
  func.func @transform_13(%arg0: i32, %arg1: i32) -> (i32, i32) {
    %c0_i32 = arith.constant 0 : i32
    %c0_i32_0 = arith.constant 0 : i32
    return %arg0, %c0_i32 : i32, i32
  }
}

</mosaic_0001>

<bundles_post_ra>
// kernel: ernie_pretraining_heads.1
= control target key start
LH: loop header
LB: loop body
LE: loop exit
PB: predicated region body
PF: predicated region fallthrough
CT: control target
= control target key end

     0   :  { %19 = vsyncpa [#allocation4], 0  ;;  %s1564_s0 = inlined_call_operand.hbm [shape: f32[16,32], index: 0, kind: input, shape index: {}]   ;;  %s1565_s1 = inlined_call_operand.hbm [shape: f32[32,32], index: 1, kind: input, shape index: {}]   ;;  %s1566_s2 = inlined_call_operand.hbm [shape: f32[1,32], index: 2, kind: input, shape index: {}]   ;;  %s1567_s3 = inlined_call_operand.hbm [shape: f32[1,32], index: 3, kind: input, shape index: {}, may-alias: {3,9}]   ;;  %s1568_s4 = inlined_call_operand.hbm [shape: f32[1,32], index: 4, kind: input, shape index: {}, may-alias: {4,10}]   ;;  %s1569_s5 = inlined_call_operand.hbm [shape: f32[32,128], index: 5, kind: input, shape index: {}]   ;;  %s1570_s6 = inlined_call_operand.hbm [shape: f32[1,128], index: 6, kind: input, shape index: {}]   ;;  %s1571_s7 = inlined_call_operand.hbm [shape: f32[32,32], index: 7, kind: input, shape index: {}]   ;;  %s1572_s8 = inlined_call_operand.hbm [shape: f32[1,32], index: 8, kind: input, shape index: {}]   ;;  %s1573_s9 = inlined_call_operand.hbm [shape: f32[1,32], index: 9, kind: input, shape index: {}, may-alias: {3,9}]   ;;  %s1574_s10 = inlined_call_operand.hbm [shape: f32[1,32], index: 10, kind: input, shape index: {}, may-alias: {4,10}]   ;;  %s1575_s11 = inlined_call_operand.hbm [shape: f32[32,128], index: 11, kind: input, shape index: {}]   ;;  %s1576_s12 = inlined_call_operand.hbm [shape: f32[16,128], index: 12, kind: output, shape index: {0}]   ;;  %s1577_s13 = inlined_call_operand.hbm [shape: f32[16,128], index: 13, kind: output, shape index: {1}]  }
   0x1   :  { %20 = vsyncpa [#allocation7], 0 }
   0x2   :  { %21 = vsyncpa [#allocation10], 0 }
   0x3   :  { %22 = vsyncpa [#allocation13], 0 }
   0x4   :  { %23 = vsyncpa [#allocation16], 0 }
   0x5   :  { %24 = vsyncpa [#allocation19], 0 }
   0x6   :  { %25 = vsyncpa [#allocation22], 0 }
   0x7   :  { %26 = vsyncpa [#allocation5], 0 }
   0x8   :  { %27 = vsyncpa [#allocation25], 0  ;;  %s1222_s25 = smov [#allocation6]   ;;  %s1223_s27 = smov [#allocation9]  }
   0x9   :  { %s45_s26 = sshll.u32 %s1222_s25, 4  ;;  %s68_s28 = sshll.u32 %s1223_s27, 4  ;;  %s46_s26 = int_to_ptr.vmem [resolvable:$true] %s45_s26  ;;  %s1308_s28 = int_to_ptr.vmem [resolvable:$true] %s68_s28 }
   0xa   :  { %s896_s14 = scalar_lea.hbm %s1565_s1, 512 }
   0xb   :  { %p897_p0 = scmp.ne.s32.totalorder %s1565_s1, %s896_s14  ;;  %p900_p1 = scmp.lt.u32.totalorder %s896_s14, %s1565_s1 }
   0xd   :  { %p902_p2 = pnand %p900_p1, %p897_p0 }
   0xf   :  { %905 = shalt.err (!%p902_p2)
}
  0x10   :  { %s906_s19 = scalar_lea.vmem %s46_s26, 512  ;;  %p911_p4 = scmp.lt.s32.totalorder %s46_s26, %s46_s26 }
  0x11   :  { %p907_p3 = scmp.ne.s32.totalorder %s46_s26, %s906_s19  ;;  %p912_p5 = scmp.lt.s32.totalorder %s906_s19, %s906_s19 }
  0x13   :  { %p913_p6 = por %p912_p5, %p911_p4 }
  0x15   :  { %p914_p7 = pnand %p913_p6, %p907_p3 }
  0x17   :  { %917 = shalt.err (!%p914_p7)
}
  0x18   :  { %s1224_s20 = smov 128   ;;  %s1225_s21 = smov 8  }
  0x19   :  { %51 = dma.hbm_to_vmem [thread:$0]  %s1565_s1, 512, %s46_s26, [#allocation7], %s1224_s20, %s1224_s20, %s1225_s21  }
  0x1a   :  { %s918_s27 = scalar_lea.hbm %s1567_s3, 16 }
  0x1b   :  { %p919_p8 = scmp.ne.s32.totalorder %s1567_s3, %s918_s27  ;;  %p922_p9 = scmp.lt.u32.totalorder %s918_s27, %s1567_s3 }
  0x1d   :  { %p924_p10 = pnand %p922_p9, %p919_p8 }
  0x1f   :  { %927 = shalt.err (!%p924_p10)
}
  0x20   :  { %s928_s16 = scalar_lea.vmem %s1308_s28, 16  ;;  %s932_s1 = scalar_lea.vmem %s1308_s28, 32 }
  0x21   :  { %p929_p11 = scmp.ne.s32.totalorder %s1308_s28, %s928_s16  ;;  %p933_p12 = scmp.lt.s32.totalorder %s1308_s28, %s1308_s28 }
  0x22   :  { %p934_p13 = scmp.lt.s32.totalorder %s932_s1, %s928_s16 }
  0x24   :  { %p935_p0 = por %p934_p13, %p933_p12 }
  0x26   :  { %p936_p1 = pnand %p935_p0, %p929_p11 }
  0x28   :  { %939 = shalt.err (!%p936_p1)
}
  0x29   :  { %71 = dma.hbm_to_vmem [thread:$0]  %s1567_s3, 16, %s1308_s28, [#allocation10]  }
  0x2a   :  { %s1226_s18 = smov [#allocation12]   ;;  %s1227_s22 = smov [#allocation15]  }
  0x2b   :  { %s87_s19 = sshll.u32 %s1226_s18, 4  ;;  %s109_s23 = sshll.u32 %s1227_s22, 4  ;;  %s88_s19 = int_to_ptr.vmem [resolvable:$true] %s87_s19  ;;  %s1343_s23 = int_to_ptr.vmem [resolvable:$true] %s109_s23 }
  0x2c   :  { %s940_s27 = scalar_lea.hbm %s1569_s5, 512 }
  0x2d   :  { %p941_p2 = scmp.ne.s32.totalorder %s1569_s5, %s940_s27  ;;  %p944_p3 = scmp.lt.u32.totalorder %s940_s27, %s1569_s5 }
  0x2f   :  { %p946_p4 = pnand %p944_p3, %p941_p2 }
  0x31   :  { %949 = shalt.err (!%p946_p4)
}
  0x32   :  { %s950_s3 = scalar_lea.vmem %s88_s19, 512  ;;  %p955_p6 = scmp.lt.s32.totalorder %s88_s19, %s88_s19 }
  0x33   :  { %p951_p5 = scmp.ne.s32.totalorder %s88_s19, %s950_s3  ;;  %p956_p7 = scmp.lt.s32.totalorder %s950_s3, %s950_s3 }
  0x35   :  { %p957_p8 = por %p956_p7, %p955_p6 }
  0x37   :  { %p958_p9 = pnand %p957_p8, %p951_p5 }
  0x39   :  { %961 = shalt.err (!%p958_p9)
}
  0x3a   :  { %93 = dma.hbm_to_vmem [thread:$0]  %s1569_s5, 512, %s88_s19, [#allocation13], %s1224_s20, %s1224_s20, %s1225_s21  }
  0x3b   :  { %s962_s17 = scalar_lea.hbm %s1571_s7, 512 }
  0x3c   :  { %p963_p10 = scmp.ne.s32.totalorder %s1571_s7, %s962_s17  ;;  %p966_p11 = scmp.lt.u32.totalorder %s962_s17, %s1571_s7 }
  0x3e   :  { %p968_p12 = pnand %p966_p11, %p963_p10 }
  0x40   :  { %971 = shalt.err (!%p968_p12)
}
  0x41   :  { %s972_s27 = scalar_lea.vmem %s1343_s23, 512  ;;  %p977_p0 = scmp.lt.s32.totalorder %s1343_s23, %s1343_s23 }
  0x42   :  { %p973_p13 = scmp.ne.s32.totalorder %s1343_s23, %s972_s27  ;;  %p978_p1 = scmp.lt.s32.totalorder %s972_s27, %s972_s27 }
  0x44   :  { %p979_p2 = por %p978_p1, %p977_p0 }
  0x46   :  { %p980_p3 = pnand %p979_p2, %p973_p13 }
  0x48   :  { %983 = shalt.err (!%p980_p3)
}
  0x49   :  { %115 = dma.hbm_to_vmem [thread:$0]  %s1571_s7, 512, %s1343_s23, [#allocation16], %s1224_s20, %s1224_s20, %s1225_s21  }
  0x4a   :  { %s1228_s29 = smov [#allocation18]   ;;  %s1229_s14 = smov [#allocation3]  }
  0x4b   :  { %s132_s30 = sshll.u32 %s1228_s29, 4  ;;  %s33_s15 = sshll.u32 %s1229_s14, 4  ;;  %s133_s30 = int_to_ptr.vmem [resolvable:$true] %s132_s30  ;;  %s1380_s15 = int_to_ptr.vmem [resolvable:$true] %s33_s15 }
  0x4c   :  { %s984_s16 = scalar_lea.hbm %s1573_s9, 16 }
  0x4d   :  { %p985_p4 = scmp.ne.s32.totalorder %s1573_s9, %s984_s16  ;;  %p988_p5 = scmp.lt.u32.totalorder %s984_s16, %s1573_s9 }
  0x4f   :  { %p990_p6 = pnand %p988_p5, %p985_p4 }
  0x51   :  { %993 = shalt.err (!%p990_p6)
}
  0x52   :  { %s994_s7 = scalar_lea.vmem %s133_s30, 16  ;;  %s998_s23 = scalar_lea.vmem %s133_s30, 32 }
  0x53   :  { %p995_p7 = scmp.ne.s32.totalorder %s133_s30, %s994_s7  ;;  %p999_p8 = scmp.lt.s32.totalorder %s133_s30, %s133_s30 }
  0x54   :  { %p1000_p9 = scmp.lt.s32.totalorder %s998_s23, %s994_s7 }
  0x56   :  { %p1001_p10 = por %p1000_p9, %p999_p8 }
  0x58   :  { %p1002_p11 = pnand %p1001_p10, %p995_p7 }
  0x5a   :  { %1005 = shalt.err (!%p1002_p11)
}
  0x5b   :  { %135 = dma.hbm_to_vmem [thread:$0]  %s1573_s9, 16, %s133_s30, [#allocation19]  }
  0x5c   :  { %s1006_s5 = scalar_lea.hbm %s1564_s0, 256 }
  0x5d   :  { %p1007_p12 = scmp.ne.s32.totalorder %s1564_s0, %s1006_s5  ;;  %p1010_p13 = scmp.lt.u32.totalorder %s1006_s5, %s1564_s0 }
  0x5f   :  { %p1012_p0 = pnand %p1010_p13, %p1007_p12 }
  0x61   :  { %1015 = shalt.err (!%p1012_p0)
}
  0x62   :  { %s1016_s28 = scalar_lea.vmem %s1380_s15, 256  ;;  %p1021_p2 = scmp.lt.s32.totalorder %s1380_s15, %s1380_s15 }
  0x63   :  { %p1017_p1 = scmp.ne.s32.totalorder %s1380_s15, %s1016_s28  ;;  %p1022_p3 = scmp.lt.s32.totalorder %s1016_s28, %s1016_s28 }
  0x65   :  { %p1023_p4 = por %p1022_p3, %p1021_p2 }
  0x67   :  { %p1024_p5 = pnand %p1023_p4, %p1017_p1 }
  0x69   :  { %1027 = shalt.err (!%p1024_p5)
}
  0x6a   :  { %39 = dma.hbm_to_vmem [thread:$0]  %s1564_s0, 256, %s1380_s15, [#allocation4], %s1224_s20, %s1224_s20, %s1225_s21  }
  0x6b   :  { %s1230_s16 = smov [#allocation8]   ;;  %s1231_s26 = smov [#allocation11]  }
  0x6c   :  { %s58_s1 = sshll.u32 %s1230_s16, 4  ;;  %s78_s17 = sshll.u32 %s1231_s26, 4  ;;  %s59_s1 = int_to_ptr.vmem [resolvable:$true] %s58_s1  ;;  %s79_s17 = int_to_ptr.vmem [resolvable:$true] %s78_s17 }
  0x6d   :  { %s1028_s23 = scalar_lea.hbm %s1566_s2, 16 }
  0x6e   :  { %p1029_p6 = scmp.ne.s32.totalorder %s1566_s2, %s1028_s23  ;;  %p1032_p7 = scmp.lt.u32.totalorder %s1028_s23, %s1566_s2 }
  0x70   :  { %p1034_p8 = pnand %p1032_p7, %p1029_p6 }
  0x72   :  { %1037 = shalt.err (!%p1034_p8)
}
  0x73   :  { %s1038_s0 = scalar_lea.vmem %s59_s1, 16  ;;  %s1042_s15 = scalar_lea.vmem %s59_s1, 32 }
  0x74   :  { %p1039_p9 = scmp.ne.s32.totalorder %s59_s1, %s1038_s0  ;;  %p1043_p10 = scmp.lt.s32.totalorder %s59_s1, %s59_s1 }
  0x75   :  { %p1044_p11 = scmp.lt.s32.totalorder %s1042_s15, %s1038_s0 }
  0x77   :  { %p1045_p12 = por %p1044_p11, %p1043_p10 }
  0x79   :  { %p1046_p13 = pnand %p1045_p12, %p1039_p9 }
  0x7b   :  { %1049 = shalt.err (!%p1046_p13)
}
  0x7c   :  { %61 = dma.hbm_to_vmem [thread:$0]  %s1566_s2, 16, %s59_s1, [#allocation7]  }
  0x7d   :  { %s1050_s3 = scalar_lea.hbm %s1568_s4, 16 }
  0x7e   :  { %p1051_p0 = scmp.ne.s32.totalorder %s1568_s4, %s1050_s3  ;;  %p1054_p1 = scmp.lt.u32.totalorder %s1050_s3, %s1568_s4 }
  0x80   :  { %p1056_p2 = pnand %p1054_p1, %p1051_p0 }
  0x82   :  { %1059 = shalt.err (!%p1056_p2)
}
  0x83   :  { %s1060_s26 = scalar_lea.vmem %s79_s17, 16  ;;  %s1064_s18 = scalar_lea.vmem %s79_s17, 32 }
  0x84   :  { %p1061_p3 = scmp.ne.s32.totalorder %s79_s17, %s1060_s26  ;;  %p1065_p4 = scmp.lt.s32.totalorder %s79_s17, %s79_s17 }
  0x85   :  { %p1066_p5 = scmp.lt.s32.totalorder %s1064_s18, %s1060_s26 }
  0x87   :  { %p1067_p6 = por %p1066_p5, %p1065_p4 }
  0x89   :  { %p1068_p7 = pnand %p1067_p6, %p1061_p3 }
  0x8b   :  { %1071 = shalt.err (!%p1068_p7)
}
  0x8c   :  { %81 = dma.hbm_to_vmem [thread:$0]  %s1568_s4, 16, %s79_s17, [#allocation10]  }
  0x8d   :  { %s1232_s7 = smov [#allocation14]   ;;  %s1233_s22 = smov [#allocation17]  }
  0x8e   :  { %s100_s23 = sshll.u32 %s1232_s7, 4  ;;  %s122_s24 = sshll.u32 %s1233_s22, 4  ;;  %s101_s23 = int_to_ptr.vmem [resolvable:$true] %s100_s23  ;;  %s123_s24 = int_to_ptr.vmem [resolvable:$true] %s122_s24 }
  0x8f   :  { %s1072_s0 = scalar_lea.hbm %s1570_s6, 16 }
  0x90   :  { %p1073_p8 = scmp.ne.s32.totalorder %s1570_s6, %s1072_s0  ;;  %p1076_p9 = scmp.lt.u32.totalorder %s1072_s0, %s1570_s6 }
  0x92   :  { %p1078_p10 = pnand %p1076_p9, %p1073_p8 }
  0x94   :  { %1081 = shalt.err (!%p1078_p10)
}
  0x95   :  { %s1082_s4 = scalar_lea.vmem %s101_s23, 16  ;;  %s1086_s17 = scalar_lea.vmem %s101_s23, 32 }
  0x96   :  { %p1083_p11 = scmp.ne.s32.totalorder %s101_s23, %s1082_s4  ;;  %p1087_p12 = scmp.lt.s32.totalorder %s101_s23, %s101_s23 }
  0x97   :  { %p1088_p13 = scmp.lt.s32.totalorder %s1086_s17, %s1082_s4 }
  0x99   :  { %p1089_p0 = por %p1088_p13, %p1087_p12 }
  0x9b   :  { %p1090_p1 = pnand %p1089_p0, %p1083_p11 }
  0x9d   :  { %1093 = shalt.err (!%p1090_p1)
}
  0x9e   :  { %103 = dma.hbm_to_vmem [thread:$0]  %s1570_s6, 16, %s101_s23, [#allocation13]  }
  0x9f   :  { %s1094_s30 = scalar_lea.hbm %s1572_s8, 16 }
  0xa0   :  { %p1095_p2 = scmp.ne.s32.totalorder %s1572_s8, %s1094_s30  ;;  %p1098_p3 = scmp.lt.u32.totalorder %s1094_s30, %s1572_s8 }
  0xa2   :  { %p1100_p4 = pnand %p1098_p3, %p1095_p2 }
  0xa4   :  { %1103 = shalt.err (!%p1100_p4)
}
  0xa5   :  { %s1104_s1 = scalar_lea.vmem %s123_s24, 16  ;;  %s1108_s7 = scalar_lea.vmem %s123_s24, 32 }
  0xa6   :  { %p1105_p5 = scmp.ne.s32.totalorder %s123_s24, %s1104_s1  ;;  %p1109_p6 = scmp.lt.s32.totalorder %s123_s24, %s123_s24 }
  0xa7   :  { %p1110_p7 = scmp.lt.s32.totalorder %s1108_s7, %s1104_s1 }
  0xa9   :  { %p1111_p8 = por %p1110_p7, %p1109_p6 }
  0xab   :  { %p1112_p9 = pnand %p1111_p8, %p1105_p5 }
  0xad   :  { %1115 = shalt.err (!%p1112_p9)
}
  0xae   :  { %125 = dma.hbm_to_vmem [thread:$0]  %s1572_s8, 16, %s123_s24, [#allocation16]  }
  0xaf   :  { %s1234_s22 = smov [#allocation20]   ;;  %s1235_s27 = smov [#allocation21]  }
  0xb0   :  { %s142_s25 = sshll.u32 %s1234_s22, 4  ;;  %s151_s0 = sshll.u32 %s1235_s27, 4  ;;  %s143_s25 = int_to_ptr.vmem [resolvable:$true] %s142_s25  ;;  %s1462_s0 = int_to_ptr.vmem [resolvable:$true] %s151_s0 }
  0xb1   :  { %s1116_s19 = scalar_lea.hbm %s1574_s10, 16 }
  0xb2   :  { %p1117_p10 = scmp.ne.s32.totalorder %s1574_s10, %s1116_s19  ;;  %p1120_p11 = scmp.lt.u32.totalorder %s1116_s19, %s1574_s10 }
  0xb4   :  { %p1122_p12 = pnand %p1120_p11, %p1117_p10 }
  0xb6   :  { %1125 = shalt.err (!%p1122_p12)
}
  0xb7   :  { %s1126_s8 = scalar_lea.vmem %s143_s25, 16  ;;  %s1130_s24 = scalar_lea.vmem %s143_s25, 32 }
  0xb8   :  { %p1127_p13 = scmp.ne.s32.totalorder %s143_s25, %s1126_s8  ;;  %p1131_p0 = scmp.lt.s32.totalorder %s143_s25, %s143_s25 }
  0xb9   :  { %p1132_p1 = scmp.lt.s32.totalorder %s1130_s24, %s1126_s8 }
  0xbb   :  { %p1133_p2 = por %p1132_p1, %p1131_p0 }
  0xbd   :  { %p1134_p3 = pnand %p1133_p2, %p1127_p13 }
  0xbf   :  { %1137 = shalt.err (!%p1134_p3)
}
  0xc0   :  { %145 = dma.hbm_to_vmem [thread:$0]  %s1574_s10, 16, %s143_s25, [#allocation19]  }
  0xc1   :  { %s1138_s16 = scalar_lea.hbm %s1575_s11, 512 }
  0xc2   :  { %p1139_p4 = scmp.ne.s32.totalorder %s1575_s11, %s1138_s16  ;;  %p1142_p5 = scmp.lt.u32.totalorder %s1138_s16, %s1575_s11 }
  0xc4   :  { %p1144_p6 = pnand %p1142_p5, %p1139_p4 }
  0xc6   :  { %1147 = shalt.err (!%p1144_p6)
}
  0xc7   :  { %s1148_s7 = scalar_lea.vmem %s1462_s0, 512  ;;  %p1153_p8 = scmp.lt.s32.totalorder %s1462_s0, %s1462_s0 }
  0xc8   :  { %p1149_p7 = scmp.ne.s32.totalorder %s1462_s0, %s1148_s7  ;;  %p1154_p9 = scmp.lt.s32.totalorder %s1148_s7, %s1148_s7 }
  0xca   :  { %p1155_p10 = por %p1154_p9, %p1153_p8 }
  0xcc   :  { %p1156_p11 = pnand %p1155_p10, %p1149_p7 }
  0xce   :  { %1159 = shalt.err (!%p1156_p11)
}
  0xcf   :  { %157 = dma.hbm_to_vmem [thread:$0]  %s1575_s11, 512, %s1462_s0, [#allocation22], %s1224_s20, %s1224_s20, %s1225_s21  }
  0xd0   :  { %1204 = dma.done.wait [#allocation4], 256  }
  0xd1   :  { %1205 = vsyncadd [#allocation4], 4294967040 }
  0xd2   :  { %1206 = dma.done.wait [#allocation7], 528  }
  0xd3   :  { %1207 = vsyncadd [#allocation7], 4294966768 }
  0xd4   :  { %1208 = dma.done.wait [#allocation10], 32  }
  0xd5   :  { %1209 = vsyncadd [#allocation10], 4294967264 }
  0xd6   :  { %1210 = dma.done.wait [#allocation13], 528  }
  0xd7   :  { %1211 = vsyncadd [#allocation13], 4294966768 }
  0xd8   :  { %1212 = dma.done.wait [#allocation16], 528  }
  0xd9   :  { %1213 = vsyncadd [#allocation16], 4294966768 }
  0xda   :  { %1214 = dma.done.wait [#allocation19], 32  }
  0xdb   :  { %1215 = vsyncadd [#allocation19], 4294967264 }
  0xdc   :  { %1216 = dma.done.wait [#allocation22], 512  }
  0xdd   :  { %1217 = vsyncadd [#allocation22], 4294966784  ;;  %v200_v0 = vld [vmem:[#allocation6] sm:$0xff]  ;;  %v201_v1 = vld [vmem:[#allocation6 + $0x8] sm:$0xff]  ;;  %vm211_vm0 = vcmask 261120   ;;  %s1236_s11 = smov [#allocation24]  }
  0xde   :  { %v364_v2 = vld [vmem:[#allocation15] sm:$0xff]  ;;  %v824_v3 = vpack.c.bf16 %v201_v1, %v200_v0  ;;  %v365_v4 = vld [vmem:[#allocation15 + $0x8] sm:$0xff]  ;;  %v203_v6 = vld [vmem:[#allocation6 + $0x18] sm:$0xff]  ;;  %s719_s23 = sshll.u32 %s1236_s11, 4  ;;  %s1237_s22 = smov [#allocation23]   ;;  %s720_s23 = int_to_ptr.vmem [resolvable:$true] %s719_s23 }
  0xdf   :  { %v202_v5 = vld [vmem:[#allocation6 + $0x10] sm:$0xff]  ;;  %v832_v7 = vpack.c.bf16 %v365_v4, %v364_v2  ;;  %v366_v9 = vld [vmem:[#allocation15 + $0x10] sm:$0xff]  ;;  %v367_v10 = vld [vmem:[#allocation15 + $0x18] sm:$0xff]  ;;  %s707_s25 = sshll.u32 %s1237_s22, 4  ;;  %s1160_s27 = scalar_lea.vmem %s720_s23, 256  ;;  %s708_s25 = int_to_ptr.vmem [resolvable:$true] %s707_s25 }
  0xe0   :  { %v828_v8 = vpack.c.bf16 %v203_v6, %v202_v5  ;;  %v198_v11 = vld [vmem:[#allocation3] sm:$0xff]  ;;  %825 = vmatprep.subr.bf16.mxu0 %v824_v3  ;;  %v836_v12 = vpack.c.bf16 %v367_v10, %v366_v9  ;;  %v199_v13 = vld [vmem:[#allocation3 + $0x8] sm:$0xff]  ;;  %v741_v14 = vld [vmem:[#allocation8] ss:$0 sm:$0xff]  ;;  %p1161_p12 = scmp.ne.s32.totalorder %s720_s23, %s1160_s27  ;;  %p1165_p13 = scmp.lt.s32.totalorder %s720_s23, %s720_s23 }
  0xe1   :  { %788 = vmatprep.mubr.msk.f32.mxu0 %vm211_vm0, %v198_v11  ;;  %833 = vmatprep.subr.bf16.mxu1 %v832_v7  ;;  %v746_v15 = vld [vmem:[#allocation17] ss:$0 sm:$0xff]  ;;  %v518_v4 = vld [vmem:[#allocation21] sm:$0xff]  ;;  %v519_v5 = vld [vmem:[#allocation21 + $0x8] sm:$0xff]  ;;  %p1166_p0 = scmp.lt.s32.totalorder %s1160_s27, %s1160_s27 }
  0xe2   :  { %827 = vmatpush3.bf16.msra.mxu0 %v824_v3  ;;  %835 = vmatpush3.bf16.msra.mxu1 %v832_v7  ;;  %v840_v6 = vpack.c.bf16 %v519_v5, %v518_v4  ;;  %v520_v7 = vld [vmem:[#allocation21 + $0x10] sm:$0xff]  ;;  %v607_v10 = vld [vmem:[#allocation12] sm:$0xff] }
  0xe3   :  { %829 = vmatprep.subr.bf16.mxu0 %v828_v8  ;;  %837 = vmatprep.subr.bf16.mxu1 %v836_v12  ;;  %p1167_p1 = por %p1166_p0, %p1165_p13 }
  0xe4   :  { %799 = vmatprep.mubr.msk.f32.mxu1 %vm211_vm0, %v198_v11  ;;  %v608_v11 = vld [vmem:[#allocation12 + $0x8] sm:$0xff] }
  0xe5   :  { %p1168_p2 = pnand %p1167_p1, %p1161_p12 }
  0xe6   :  { %831 = vmatpush3.bf16.msra.mxu0 %v828_v8  ;;  %839 = vmatpush3.bf16.msra.mxu1 %v836_v12  ;;  %v521_v8 = vld [vmem:[#allocation21 + $0x18] sm:$0xff]  ;;  %v848_v12 = vpack.c.bf16 %v608_v11, %v607_v10 }
  0xe7   :  { %841 = vmatprep.subr.bf16.mxu0 %v840_v6  ;;  %v844_v9 = vpack.c.bf16 %v521_v8, %v520_v7  ;;  %v753_v8 = vld [vmem:[#allocation14] ss:$0 sm:$0xff] }
  0xe8   :  { %849 = vmatprep.subr.bf16.mxu1 %v848_v12 }
  0xe9   :  { %789 = vmatmul.mubr.msk.f32.vlgmr.msra.gmra.mrb[0].mxu0 %vm211_vm0, %v199_v13  ;;  %800 = vmatmul.mubr.msk.f32.vlgmr.msra.gmra.mrb[0].mxu1 %vm211_vm0, %v199_v13  ;;  %v609_v13 = vld [vmem:[#allocation12 + $0x10] sm:$0xff] }
  0xea   :  { %843 = vmatpush3.bf16.msra.mxu0 %v840_v6  ;;  %851 = vmatpush3.bf16.msra.mxu1 %v848_v12 }
  0xeb   :  { %845 = vmatprep.subr.bf16.mxu0 %v844_v9 }
  0xee   :  { %847 = vmatpush3.bf16.msra.mxu0 %v844_v9 }
 0x1bc   :  { %v790_v16 = vpop.f32.mrb[0].mxu0  ;;  %v801_v18 = vpop.f32.mrb[0].mxu1 }
 0x1bd   :  { %v290_v17 = vadd.f32 %v790_v16, %v741_v14  ;;  %v284_v19 = vpop.f32.mrb[1].mxu0  ;;  %v447_v20 = vadd.f32 %v801_v18, %v746_v15  ;;  %v441_v22 = vpop.f32.mrb[1].mxu1 }
 0x1be   :  { %v285_v21 = vadd.f32 %v741_v14, %v284_v19  ;;  %v442_v24 = vadd.f32 %v746_v15, %v441_v22  ;;  %v610_v14 = vld [vmem:[#allocation12 + $0x18] sm:$0xff] }
 0x1bf   :  { %v296_v23 = vmul.f32 0.70710677, %v290_v17  ;;  %v453_v25 = vmul.f32 0.70710677, %v447_v20  ;;  %v294_v38 = vmul.f32 0.5, %v290_v17  ;;  %v451_v40 = vmul.f32 0.5, %v447_v20 }
 0x1c0   :  { %v295_v26 = vmul.f32 0.70710677, %v285_v21  ;;  %v452_v27 = vmul.f32 0.70710677, %v442_v24  ;;  %v293_v32 = vmul.f32 0.5, %v285_v21  ;;  %v450_v35 = vmul.f32 0.5, %v442_v24 }
 0x1c1   :  { %872 = verf.f32 %v296_v23  ;;  %v852_v15 = vpack.c.bf16 %v610_v14, %v609_v13 }
 0x1c2   :  { %874 = verf.f32 %v453_v25 }
 0x1c3   :  { %876 = verf.f32 %v295_v26  ;;  %853 = vmatprep.subr.bf16.mxu1 %v852_v15 }
 0x1c4   :  { %878 = verf.f32 %v452_v27  ;;  %855 = vmatpush3.bf16.msra.mxu1 %v852_v15 }
 0x1cb   :  { %v873_v28 = vpop.eup %872 }
 0x1cc   :  { %v875_v29 = vpop.eup %874  ;;  %v300_v34 = vadd.f32 1.0, %v873_v28 }
 0x1cd   :  { %v877_v30 = vpop.eup %876  ;;  %v457_v37 = vadd.f32 1.0, %v875_v29 }
 0x1ce   :  { %v879_v31 = vpop.eup %878  ;;  %v299_v33 = vadd.f32 1.0, %v877_v30  ;;  %v302_v43 = vmul.f32 %v300_v34, %v294_v38 }
 0x1cf   :  { %v456_v36 = vadd.f32 1.0, %v879_v31  ;;  %v459_v45 = vmul.f32 %v457_v37, %v451_v40 }
 0x1d0   :  { %v301_v39 = vmul.f32 %v299_v33, %v293_v32  ;;  %v308_v46 = vsel %vm211_vm0, %v302_v43, 0.0 }
 0x1d1   :  { %v458_v41 = vmul.f32 %v456_v36, %v450_v35  ;;  %v465_v47 = vsel %vm211_vm0, %v459_v45, 0.0 }
 0x1d2   :  { %v305_v42 = vsel %vm211_vm0, %v301_v39, 0.0 }
 0x1d3   :  { %v462_v44 = vsel %vm211_vm0, %v458_v41, 0.0  ;;  %306 = vadd.xlane.f32.xlu0 %v305_v42 }
 0x1d4   :  { %463 = vadd.xlane.f32.xlu1 %v462_v44 }
 0x1d7   :  { %309 = vadd.xlane.f32.xlu0 %v308_v46 }
 0x1d8   :  { %466 = vadd.xlane.f32.xlu1 %v465_v47 }
 0x260   :  { %v307_v48 = vpop.xlane.xlu0 %306 }
 0x261   :  { %v464_v49 = vpop.xlane.xlu1 %463  ;;  %v312_v50 = vmul.f32 0.03125, %v307_v48 }
 0x262   :  { %v468_v51 = vmul.f32 0.03125, %v464_v49  ;;  %v744_v49 = vld [vmem:[#allocation9] ss:$0 sm:$0xff] }
 0x263   :  { %v1504_v52 = vsub.f32 %v301_v39, %v312_v50 }
 0x264   :  { %v1506_v53 = vsub.f32 %v458_v41, %v468_v51  ;;  %v310_v54 = vpop.xlane.xlu0 %309  ;;  %v745_v51 = vld [vmem:[#allocation11] ss:$0 sm:$0xff] }
 0x265   :  { %v467_v55 = vpop.xlane.xlu1 %466  ;;  %v313_v56 = vmul.f32 0.03125, %v310_v54  ;;  %v316_v57 = vmul.f32 %v1504_v52, %v1504_v52 }
 0x266   :  { %v469_v58 = vmul.f32 0.03125, %v467_v55  ;;  %v472_v61 = vmul.f32 %v1506_v53, %v1506_v53 }
 0x267   :  { %v1510_v59 = vsub.f32 %v302_v43, %v313_v56  ;;  %v318_v60 = vsel %vm211_vm0, %v316_v57, 0.0 }
 0x268   :  { %v1515_v62 = vsub.f32 %v459_v45, %v469_v58  ;;  %319 = vadd.xlane.f32.xlu0 %v318_v60  ;;  %v474_v0 = vsel %vm211_vm0, %v472_v61, 0.0  ;;  %v749_v60 = vld [vmem:[#allocation18] ss:$0 sm:$0xff] }
 0x269   :  { %v317_v63 = vmul.f32 %v1510_v59, %v1510_v59 }
 0x26a   :  { %v473_v2 = vmul.f32 %v1515_v62, %v1515_v62 }
 0x26b   :  { %v321_v1 = vsel %vm211_vm0, %v317_v63, 0.0 }
 0x26c   :  { %475 = vadd.xlane.f32.xlu0 %v474_v0  ;;  %322 = vadd.xlane.f32.xlu1 %v321_v1  ;;  %v477_v3 = vsel %vm211_vm0, %v473_v2, 0.0  ;;  %v750_v0 = vld [vmem:[#allocation20] ss:$0 sm:$0xff] }
 0x270   :  { %478 = vadd.xlane.f32.xlu1 %v477_v3 }
 0x2f5   :  { %v320_v16 = vpop.xlane.xlu0 %319 }
 0x2f6   :  { %v324_v17 = vmul.f32 0.03125, %v320_v16 }
 0x2f8   :  { %v326_v18 = vadd.f32 1e-12, %v324_v17 }
 0x2f9   :  { %v323_v19 = vpop.xlane.xlu1 %322  ;;  %v476_v20 = vpop.xlane.xlu0 %475 }
 0x2fa   :  { %880 = vrsqrt.f32 %v326_v18  ;;  %v325_v21 = vmul.f32 0.03125, %v323_v19  ;;  %v480_v22 = vmul.f32 0.03125, %v476_v20  ;;  %vm330_vm1 = vcmp.eq.f32.partialorder %v326_v18, inf }
 0x2fb   :  { %v333_v30 = vand.u32 2147483648, %v326_v18  ;;  %vm332_vm2 = vcmp.eq.f32.partialorder %v326_v18, 0.0 }
 0x2fc   :  { %v327_v23 = vadd.f32 1e-12, %v325_v21  ;;  %v482_v24 = vadd.f32 1e-12, %v480_v22 }
 0x2fd   :  { %v479_v25 = vpop.xlane.xlu1 %478 }
 0x2fe   :  { %v481_v26 = vmul.f32 0.03125, %v479_v25  ;;  %882 = vrsqrt.f32 %v327_v23  ;;  %vm337_vm3 = vcmp.eq.f32.partialorder %v327_v23, inf  ;;  %v340_v36 = vand.u32 2147483648, %v327_v23 }
 0x2ff   :  { %884 = vrsqrt.f32 %v482_v24  ;;  %vm339_vm4 = vcmp.eq.f32.partialorder %v327_v23, 0.0  ;;  %vm486_vm5 = vcmp.eq.f32.partialorder %v482_v24, inf  ;;  %v489_v39 = vand.u32 2147483648, %v482_v24 }
 0x300   :  { %v483_v27 = vadd.f32 1e-12, %v481_v26  ;;  %vm488_vm6 = vcmp.eq.f32.partialorder %v482_v24, 0.0 }
 0x302   :  { %886 = vrsqrt.f32 %v483_v27  ;;  %vm493_vm7 = vcmp.eq.f32.partialorder %v483_v27, inf  ;;  %v496_v45 = vand.u32 2147483648, %v483_v27  ;;  %vm495_vm8 = vcmp.eq.f32.partialorder %v483_v27, 0.0 }
 0x304   :  { %v881_v28 = vpop.eup %880 }
 0x305   :  { %v329_v29 = vmul.f32 %v881_v28, %v326_v18 }
 0x307   :  { %v331_v31 = vsel %vm330_vm1, %v326_v18, %v329_v29 }
 0x308   :  { %v334_v32 = vsel %vm332_vm2, %v333_v30, %v331_v31  ;;  %v883_v33 = vpop.eup %882 }
 0x309   :  { %888 = vrcp.f32 %v334_v32  ;;  %v885_v34 = vpop.eup %884  ;;  %v336_v35 = vmul.f32 %v883_v33, %v327_v23 }
 0x30a   :  { %v485_v37 = vmul.f32 %v885_v34, %v482_v24 }
 0x30b   :  { %v338_v38 = vsel %vm337_vm3, %v327_v23, %v336_v35 }
 0x30c   :  { %v887_v40 = vpop.eup %886  ;;  %v341_v41 = vsel %vm339_vm4, %v340_v36, %v338_v38  ;;  %v487_v42 = vsel %vm486_vm5, %v482_v24, %v485_v37 }
 0x30d   :  { %890 = vrcp.f32 %v341_v41  ;;  %v490_v43 = vsel %vm488_vm6, %v489_v39, %v487_v42  ;;  %v492_v44 = vmul.f32 %v887_v40, %v483_v27 }
 0x30e   :  { %892 = vrcp.f32 %v490_v43 }
 0x30f   :  { %v494_v46 = vsel %vm493_vm7, %v483_v27, %v492_v44 }
 0x310   :  { %v497_v47 = vsel %vm495_vm8, %v496_v45, %v494_v46 }
 0x311   :  { %894 = vrcp.f32 %v497_v47 }
 0x313   :  { %v889_v48 = vpop.eup %888 }
 0x314   :  { %v343_v50 = vmul.f32 %v889_v48, %v1504_v52 }
 0x316   :  { %v352_v54 = vmul.f32 %v744_v49, %v343_v50 }
 0x317   :  { %v891_v55 = vpop.eup %890 }
 0x318   :  { %v360_v56 = vadd.f32 %v745_v51, %v352_v54  ;;  %v893_v57 = vpop.eup %892  ;;  %v345_v58 = vmul.f32 %v891_v55, %v1510_v59 }
 0x319   :  { %v499_v61 = vmul.f32 %v893_v57, %v1506_v53 }
 0x31a   :  { %362 = vst.msk [vmem:[#allocation2] sm:$0xff] %vm211_vm0, %v360_v56  ;;  %v353_v63 = vmul.f32 %v744_v49, %v345_v58 }
 0x31b   :  { %v895_v1 = vpop.eup %894  ;;  %v508_v2 = vmul.f32 %v749_v60, %v499_v61 }
 0x31c   :  { %v361_v3 = vadd.f32 %v745_v51, %v353_v63  ;;  %v501_v4 = vmul.f32 %v895_v1, %v1515_v62 }
 0x31d   :  { %v516_v52 = vadd.f32 %v750_v0, %v508_v2 }
 0x31e   :  { %363 = vst.msk [vmem:[#allocation2 + $0x8] sm:$0xff] %vm211_vm0, %v361_v3  ;;  %v509_v5 = vmul.f32 %v749_v60, %v501_v4 }
 0x31f   :  { %810 = vmatprep.mubr.msk.f32.mxu0 %vm211_vm0, %v516_v52 }
 0x320   :  { %v517_v6 = vadd.f32 %v750_v0, %v509_v5 }
 0x321   :  { %v605_v59 = vld [vmem:[#allocation2] sm:$0xff] }
 0x322   :  { %821 = vmatprep.mubr.msk.f32.mxu1 %vm211_vm0, %v605_v59  ;;  %811 = vmatmul.mubr.msk.f32.vlgmr.msra.gmra.mrb[2].mxu0 %vm211_vm0, %v517_v6 }
 0x325   :  { %v606_v53 = vld [vmem:[#allocation2 + $0x8] sm:$0xff] }
 0x326   :  { %822 = vmatmul.mubr.msk.f32.vlgmr.msra.gmra.mrb[2].mxu1 %vm211_vm0, %v606_v53 }
 0x3f5   :  { %v812_v7 = vpop.f32.mrb[2].mxu0 }
 0x3f6   :  { %604 = vst [vmem:[#allocation24 + $0x8] sm:$0xff] %v812_v7  ;;  %v594_v62 = vpop.f32.mrb[3].mxu0 }
 0x3f7   :  { %603 = vst [vmem:[#allocation24] sm:$0xff] %v594_v62 }
 0x3f8   :  { %1171 = shalt.err (!%p1168_p2)
}
 0x3f9   :  { %s1172_s5 = scalar_lea.hbm %s1577_s13, 256 }
 0x3fa   :  { %p1173_p3 = scmp.ne.s32.totalorder %s1577_s13, %s1172_s5  ;;  %p1176_p4 = scmp.lt.u32.totalorder %s1172_s5, %s1577_s13 }
 0x3fc   :  { %p1178_p5 = pnand %p1176_p4, %p1173_p3 }
 0x3fe   :  { %1181 = shalt.err (!%p1178_p5)
}
 0x3ff   :  { %725 = dma.vmem_to_hbm [thread:$0]  %s720_s23, 256, %s1577_s13, [#allocation25], %s1224_s20, %s1224_s20, %s1225_s21   ;;  %v823_v9 = vpop.f32.mrb[2].mxu1 }
 0x400   :  { %v697_v10 = vadd.f32 %v823_v9, %v753_v8  ;;  %v691_v11 = vpop.f32.mrb[3].mxu1  ;;  %s1182_s24 = scalar_lea.vmem %s708_s25, 256  ;;  %p1187_p7 = scmp.lt.s32.totalorder %s708_s25, %s708_s25 }
 0x401   :  { %v692_v12 = vadd.f32 %v753_v8, %v691_v11  ;;  %p1183_p6 = scmp.ne.s32.totalorder %s708_s25, %s1182_s24  ;;  %p1188_p8 = scmp.lt.s32.totalorder %s1182_s24, %s1182_s24 }
 0x402   :  { %701 = vst [vmem:[#allocation23 + $0x8] sm:$0xff] %v697_v10 }
 0x403   :  { %700 = vst [vmem:[#allocation23] sm:$0xff] %v692_v12  ;;  %p1189_p9 = por %p1188_p8, %p1187_p7 }
 0x405   :  { %p1190_p10 = pnand %p1189_p9, %p1183_p6 }
 0x407   :  { %1193 = shalt.err (!%p1190_p10)
}
 0x408   :  { %s1194_s9 = scalar_lea.hbm %s1576_s12, 256 }
 0x409   :  { %p1195_p11 = scmp.ne.s32.totalorder %s1576_s12, %s1194_s9  ;;  %p1198_p12 = scmp.lt.u32.totalorder %s1194_s9, %s1576_s12 }
 0x40b   :  { %p1200_p13 = pnand %p1198_p12, %p1195_p11 }
 0x40d   :  { %1203 = shalt.err (!%p1200_p13)
}
 0x40e   :  { %713 = dma.vmem_to_hbm [thread:$0]  %s708_s25, 256, %s1576_s12, [#allocation5], %s1224_s20, %s1224_s20, %s1225_s21  }
 0x40f   :  { %1218 = dma.done.wait [#allocation5], 256  }
 0x410   :  { %1219 = vsyncadd [#allocation5], 4294967040 }
 0x411   :  { %1220 = dma.done.wait [#allocation25], 256  }
 0x412   :  { %1221 = vsyncadd [#allocation25], 4294967040 }
 0x413   :  { %732 = vsyncpa [#allocation4], 1 }
 0x414   :  { %733 = vsyncpa [#allocation7], 1 }
 0x415   :  { %734 = vsyncpa [#allocation10], 1 }
 0x416   :  { %735 = vsyncpa [#allocation13], 1 }
 0x417   :  { %736 = vsyncpa [#allocation16], 1 }
 0x418   :  { %737 = vsyncpa [#allocation19], 1 }
 0x419   :  { %738 = vsyncpa [#allocation22], 1 }
 0x41a   :  { %739 = vsyncpa [#allocation5], 1 }
 0x41b   :  { %740 = vsyncpa [#allocation25], 1 }

</bundles_post_ra>
